<compile_context>
chip_gen: v7x
topology: tpu7x:2x2x1
jax: 0.10.0
libtpu: 0.0.40
codegen_flags: <defaults>
</compile_context>

<pallas_src>
import numpy as np
import jax
import jax.numpy as jnp
from jax import lax
from jax.experimental import pallas as pl
from jax.experimental.pallas import tpu as pltpu


def _cdiv(a, b):
    return -(-a // b)


def _round_up(a, b):
    return _cdiv(a, b) * b


# -----------------------------------------------------------------------------
# Parameter init (mirrors PyTorch init_kernels: periodic Hamming ** 0.5,
# pinv'd synthesis basis; win_type='hamming', invers=True).
# -----------------------------------------------------------------------------
def init_kernels(win_len, win_inc, fft_len, win_type="hamming", invers=False):
    if win_type is None or win_type == "None":
        window = np.ones(win_len)
    else:
        n = np.arange(win_len)
        window = (0.54 - 0.46 * np.cos(2.0 * np.pi * n / win_len)) ** 0.5
    N = fft_len
    fourier_basis = np.fft.rfft(np.eye(N))[:win_len]            # (win_len, N//2+1)
    real_kernel = np.real(fourier_basis)
    imag_kernel = np.imag(fourier_basis)
    kernel = np.concatenate([real_kernel, imag_kernel], 1).T    # (N+2, win_len)
    if invers:
        kernel = np.linalg.pinv(kernel).T                       # (N+2, win_len)
    kernel = kernel * window
    return kernel.astype(np.float32), window.astype(np.float32)


# -----------------------------------------------------------------------------
# Fused streaming kernel: synthesis matmul + fold overlap-add + normalize.
# -----------------------------------------------------------------------------
def _make_istft_kernel(tT, R, sp, T, c_rows, steady_idx, special_rows):
    Rm1 = R - 1

    def kernel(x_ref, w_ref, inv_ref, out_ref, acc_ref, carry_ref):
        # x_ref:    (1, C, tT)        raw NCW spectra block (f32)
        # w_ref:    (C, R*sp)         bf16 synthesis taps, lane-dense chunks
        # inv_ref:  (n_tbl, sp)       tiny normalizer table (head/steady/tail)
        # out_ref:  (1, tT, sp)       write-once streaming output tile (f32)
        # acc_ref:  (tT + c_rows, sp) fold accumulator (scratch)
        # carry_ref:(c_rows, sp)      R-1 overlap rows carried to next tile
        ti = pl.program_id(1)

        @pl.when(ti == 0)
        def _init_carry():
            carry_ref[...] = jnp.zeros_like(carry_ref)

        # ---- synthesis matmul (MXU, bf16, f32 accumulation) -----------------
        lane = lax.broadcasted_iota(jnp.int32, (1, tT), 1)
        valid = (ti * tT + lane) < T                 # masks partial/flush tiles
        x = jnp.where(valid, x_ref[0], 0.0).astype(jnp.bfloat16)   # (C, tT)
        frames = lax.dot_general(
            x, w_ref[...],
            dimension_numbers=(((0,), (0,)), ((), ())),
            preferred_element_type=jnp.float32)                    # (tT, R*sp)

        # ---- fold (overlap-add) into the small local accumulator ------------
        acc_ref[pl.ds(0, tT), :] = frames[:, 0:sp]
        acc_ref[pl.ds(tT, c_rows), :] = jnp.zeros((c_rows, sp), jnp.float32)
        for r in range(1, R):
            acc_ref[pl.ds(r, tT), :] += frames[:, r * sp:(r + 1) * sp]
        if Rm1 > 0:
            # spill carried over from the previous tile
            acc_ref[pl.ds(0, Rm1), :] += carry_ref[pl.ds(0, Rm1), :]

        # ---- per-row window-energy normalizer (tiny table, VPU selects) -----
        row = lax.broadcasted_iota(jnp.int32, (tT, 1), 0) + ti * tT
        inv = jnp.broadcast_to(inv_ref[pl.ds(steady_idx, 1), :], (tT, sp))
        for s_glob, tbl_row in special_rows:
            inv = jnp.where(row == s_glob, inv_ref[pl.ds(tbl_row, 1), :], inv)

        # ---- write-once output tile + carry for the next tile ---------------
        out_ref[0] = acc_ref[pl.ds(0, tT), :] * inv
        if Rm1 > 0:
            carry_ref[pl.ds(0, Rm1), :] = acc_ref[pl.ds(tT, Rm1), :]

    return kernel


class ConviSTFT:
    def __init__(self, win_len, win_inc, fft_len=None, win_type="hamming",
                 feature_type="real", fix=True, max_frames_per_tile=256):
        if fft_len is None:
            self.fft_len = int(2 ** np.ceil(np.log2(win_len)))
        else:
            self.fft_len = fft_len
        kernel, window = init_kernels(win_len, win_inc, self.fft_len, win_type,
                                      invers=True)
        self.weight = jnp.asarray(kernel)            # (fft_len+2, win_len) f32
        self.window = jnp.asarray(window)            # (win_len,)
        self.win_len = win_len
        self.win_inc = win_inc
        self.stride = win_inc
        self.feature_type = feature_type

        K = win_len
        C = kernel.shape[0]
        self.R = _cdiv(K, win_inc)                   # hop chunks per frame
        self.K_pad = self.R * win_inc
        # Lane-dense chunk width (128-aligned) -> unmasked vreg slices/stores.
        self.sp = win_inc if win_inc % 128 == 0 else _round_up(win_inc, 128)
        # Frames per grid step: multiple of 128 (x lane dim / out sublane dim).
        self.tile_frames = 128 * max(1, max_frames_per_tile // 128)

        # Synthesis taps laid out (C, R, sp), zero pad lanes, stored as bf16.
        kp = np.zeros((C, self.K_pad), np.float32)
        kp[:, :K] = kernel
        w_lane = np.zeros((C, self.R, self.sp), np.float32)
        w_lane[:, :, :win_inc] = kp.reshape(C, self.R, win_inc)
        self._w = jnp.asarray(w_lane.reshape(C, self.R * self.sp)
                              ).astype(jnp.bfloat16)

        # window^2 split into hop chunks (exact, float64) for the normalizer.
        w2p = np.zeros(self.K_pad, np.float64)
        w2p[:K] = window.astype(np.float64) ** 2
        self._w2_chunks = w2p.reshape(self.R, win_inc)
        self._inv_cache = {}

    # Tiny per-T normalizer table: head rows / steady-state row / tail rows.
    def _inv_table(self, T):
        cached = self._inv_cache.get(T)
        if cached is not None:
            return cached
        R, stride, sp = self.R, self.stride, self.sp
        ch = self._w2_chunks

        def coff_row(s):
            r0 = max(0, s - (T - 1))
            r1 = min(R - 1, s)
            return ch[r0:r1 + 1].sum(axis=0)

        rows, special = [], []
        if T >= R:
            for s in range(R - 1):                                # head rows
                special.append((s, len(rows)))
                rows.append(coff_row(s))
            steady_idx = len(rows)
            rows.append(ch.sum(axis=0))                           # steady state
            for m in range(R - 1):                                # tail rows
                special.append((T + m, len(rows)))
                rows.append(coff_row(T + m))
        else:  # fewer frames than overlap factor: every row is special
            for s in range(T + R - 1):
                special.append((s, len(rows)))
                rows.append(coff_row(s))
            steady_idx = len(rows)
            rows.append(ch.sum(axis=0))
        tbl = np.stack(rows, axis=0)                              # (n_tbl, stride)
        inv = np.zeros((tbl.shape[0], sp), np.float32)
        inv[:, :stride] = (1.0 / (tbl + 1e-8)).astype(np.float32)
        cached = (jnp.asarray(inv), steady_idx, tuple(special))
        self._inv_cache[T] = cached
        return cached

    def __call__(self, inputs, phase=None):
        # inputs: [B, fft_len+2, T]  (or [B, fft_len//2+1, T] mags if phase given)
        if phase is not None:
            real = inputs * jnp.cos(phase)
            imag = inputs * jnp.sin(phase)
            inputs = jnp.concatenate([real, imag], axis=1)
        inputs = inputs.astype(jnp.float32)

        B, C, T = inputs.shape
        stride, K, R, sp = self.stride, self.win_len, self.R, self.sp
        L = (T - 1) * stride + K

        tT = self.tile_frames
        x = inputs
        if T < tT:
            # Tiny clips only: pad the frame axis once so the single x block is
            # well-formed.  Long clips are fed with zero wrapper preprocessing.
            x = jnp.pad(inputs, ((0, 0), (0, 0), (0, tT - T)))

        n_tiles = _cdiv(T, tT)
        rows_needed = T + R - 1
        n_flush = _cdiv(max(rows_needed - n_tiles * tT, 0), tT)   # carry flush
        n_steps = n_tiles + n_flush
        n_rows = n_steps * tT

        inv_tbl, steady_idx, special = self._inv_table(T)
        c_rows = _round_up(max(R - 1, 1), 8)
        last_x_tile = n_tiles - 1

        out3 = pl.pallas_call(
            _make_istft_kernel(tT, R, sp, T, c_rows, steady_idx, special),
            out_shape=jax.ShapeDtypeStruct((B, n_rows, sp), jnp.float32),
            grid=(B, n_steps),
            in_specs=[
                # Raw NCW input; flush steps clamp to the last data tile and
                # are fully masked in-kernel.
                pl.BlockSpec((1, C, tT),
                             lambda b, ti: (b, 0, jnp.minimum(ti, last_x_tile))),
                pl.BlockSpec((C, R * sp), lambda b, ti: (0, 0)),
                pl.BlockSpec(inv_tbl.shape, lambda b, ti: (0, 0)),
            ],
            # Streaming, write-once, lane-dense output tiles.
            out_specs=pl.BlockSpec((1, tT, sp), lambda b, ti: (b, ti, 0)),
            scratch_shapes=[
                pltpu.VMEM((tT + c_rows, sp), jnp.float32),   # fold accumulator
                pltpu.VMEM((c_rows, sp), jnp.float32),        # overlap carry
            ],
            compiler_params=pltpu.CompilerParams(
                dimension_semantics=("parallel", "arbitrary"),
                vmem_limit_bytes=32 * 1024 * 1024),
        )(x, self._w, inv_tbl)

        # Rows are consecutive `stride`-sample hops of the signal.
        out = out3[:, :, :stride].reshape(B, n_rows * stride)[:, :L]
        return out[:, None, :]                                    # [B, 1, L]


# -----------------------------------------------------------------------------
# Reference (exact conv_transpose1d semantics, numpy/f64; inputs and taps are
# pre-rounded to bf16 to mirror the kernel's MXU precision).
# -----------------------------------------------------------------------------
def _reference(inputs, weight, window, stride):
    x = np.asarray(jnp.asarray(inputs, jnp.bfloat16).astype(jnp.float32),
                   dtype=np.float64)
    w = np.asarray(jnp.asarray(weight, jnp.bfloat16).astype(jnp.float32),
                   dtype=np.float64)
    win2 = np.asarray(window, dtype=np.float64) ** 2
    B, C, T = x.shape
    K = w.shape[1]
    L = (T - 1) * stride + K
    frames = np.einsum("bct,ck->btk", x, w)
    out = np.zeros((B, L))
    coff = np.zeros(L)
    for t in range(T):
        out[:, t * stride:t * stride + K] += frames[:, t]
        coff[t * stride:t * stride + K] += win2
    return (out / (coff + 1e-8))[:, None, :]


if __name__ == "__main__":
    win_len, win_inc, fft_len = 16, 8, 16
    C = fft_len + 2                                   # 18

    key = jax.random.PRNGKey(0)
    k1, k2 = jax.random.split(key)

    # Small single-tile case (partial x block + in-kernel frame masking).
    model = ConviSTFT(win_len, win_inc, fft_len, win_type="hamming")
    B, T = 2, 8
    x = jax.random.normal(k1, (B, C, T), dtype=jnp.float32)
    out = jax.block_until_ready(model(x))
    ref = _reference(x, model.weight, model.window, win_inc)
    np.testing.assert_allclose(np.asarray(out), ref, rtol=2e-3, atol=2e-4)
    assert out.shape == (B, 1, (T - 1) * win_inc + win_len)

    # Multi-tile case: streaming write-once tiles, cross-tile overlap carry and
    # the trailing carry-flush step.
    model_tiled = ConviSTFT(win_len, win_inc, fft_len, win_type="hamming",
                            max_frames_per_tile=128)
    T2 = 256
    x2 = jax.random.normal(k2, (B, C, T2), dtype=jnp.float32)
    out2 = jax.block_until_ready(model_tiled(x2))
    ref2 = _reference(x2, model_tiled.weight, model_tiled.window, win_inc)
    np.testing.assert_allclose(np.asarray(out2), ref2, rtol=2e-3, atol=2e-4)
    assert out2.shape == (B, 1, (T2 - 1) * win_inc + win_len)

    print("KERNEL_OK")
</pallas_src>

<mosaic_0001>
module attributes {stable_mosaic.version = 11 : i64} {
  func.func @kernel(%arg0: i32, %arg1: i32, %arg2: memref<1x18x256xf32, #tpu.memory_space<vmem>>, %arg3: memref<18x256xbf16, #tpu.memory_space<vmem>>, %arg4: memref<3x128xf32, #tpu.memory_space<vmem>>, %arg5: memref<1x256x128xf32, #tpu.memory_space<vmem>>, %arg6: memref<264x128xf32, #tpu.memory_space<vmem>>, %arg7: memref<8x128xf32, #tpu.memory_space<vmem>>) attributes {dimension_semantics = [#tpu.dimension_semantics<parallel>, #tpu.dimension_semantics<arbitrary>], iteration_bounds = array<i64: 2, 1>, scalar_prefetch = 0 : i64, scratch_operands = 2 : i64, tpu.core_type = #tpu.core_type<tc>, window_params = [{transform_indices = @transform_0, window_bounds = array<i64: 1, 18, 256>}, {pipeline_mode = #tpu.pipeline_mode<synchronous>, transform_indices = @transform_1, window_bounds = array<i64: 18, 256>}, {pipeline_mode = #tpu.pipeline_mode<synchronous>, transform_indices = @transform_2, window_bounds = array<i64: 3, 128>}, {transform_indices = @transform_3, window_bounds = array<i64: 1, 256, 128>}]} {
    %c0_i32 = arith.constant 0 : i32
    %0 = arith.cmpi eq, %arg1, %c0_i32 : i32
    %1 = arith.extui %0 : i1 to i32
    %c0_i32_0 = arith.constant 0 : i32
    %2 = arith.cmpi ne, %1, %c0_i32_0 : i32
    scf.if %2 {
      %cst_36 = arith.constant 0.000000e+00 : f32
      %60 = vector.broadcast %cst_36 : f32 to vector<8x128xf32>
      %c0_37 = arith.constant 0 : index
      %c0_38 = arith.constant 0 : index
      %61 = vector.load %arg7[%c0_37, %c0_38] : memref<8x128xf32, #tpu.memory_space<vmem>>, vector<8x128xf32>
      tpu.vector_store %arg7[%c0_37, %c0_38], %60 {strides = array<i32>} : memref<8x128xf32, #tpu.memory_space<vmem>>, vector<8x128xf32>,
    } else {
    }
    %3 = tpu.iota {dimensions = array<i32: 1>} : vector<1x256xi32>
    %c256_i32 = arith.constant 256 : i32
    %4 = arith.muli %arg1, %c256_i32 : i32
    %5 = vector.broadcast %4 : i32 to vector<1x256xi32>
    %6 = arith.addi %5, %3 : vector<1x256xi32>
    %c8_i32 = arith.constant 8 : i32
    %7 = vector.broadcast %c8_i32 : i32 to vector<1x256xi32>
    %8 = arith.cmpi slt, %6, %7 : vector<1x256xi32>
    %c0 = arith.constant 0 : index
    %c0_1 = arith.constant 0 : index
    %c0_2 = arith.constant 0 : index
    %9 = vector.load %arg2[%c0, %c0_1, %c0_2] : memref<1x18x256xf32, #tpu.memory_space<vmem>>, vector<1x18x256xf32>
    %10 = vector.shape_cast %9 : vector<1x18x256xf32> to vector<18x256xf32>
    %cst = arith.constant 0.000000e+00 : f32
    %11 = vector.shape_cast %8 : vector<1x256xi1> to vector<1x256xi1>
    %12 = vector.broadcast %11 : vector<1x256xi1> to vector<18x256xi1>
    %13 = vector.broadcast %cst : f32 to vector<18x256xf32>
    %14 = arith.select %12, %10, %13 : vector<18x256xi1>, vector<18x256xf32>
    %15 = arith.truncf %14 : vector<18x256xf32> to vector<18x256xbf16>
    %c0_3 = arith.constant 0 : index
    %c0_4 = arith.constant 0 : index
    %16 = vector.load %arg3[%c0_3, %c0_4] : memref<18x256xbf16, #tpu.memory_space<vmem>>, vector<18x256xbf16>
    %cst_5 = arith.constant dense<0.000000e+00> : vector<256x256xf32>
    %17 = tpu.matmul %15, %16, %cst_5 {dimension_numbers = #tpu.dot_dimension_numbers<[0], [0], [1], [1], [0, 1, 1, 1], [], []>} : vector<18x256xbf16>, vector<18x256xbf16>, vector<256x256xf32> -> vector<256x256xf32>
    %18 = vector.extract_strided_slice %17 {offsets = [0, 0], sizes = [256, 128], strides = [1, 1]} : vector<256x256xf32> to vector<256x128xf32>
    %c0_6 = arith.constant 0 : index
    %c0_7 = arith.constant 0 : index
    %19 = vector.load %arg6[%c0_6, %c0_7] : memref<264x128xf32, #tpu.memory_space<vmem>>, vector<256x128xf32>
    tpu.vector_store %arg6[%c0_6, %c0_7], %18 {strides = array<i32>} : memref<264x128xf32, #tpu.memory_space<vmem>>, vector<256x128xf32>,
    %cst_8 = arith.constant 0.000000e+00 : f32
    %20 = vector.broadcast %cst_8 : f32 to vector<8x128xf32>
    %c256 = arith.constant 256 : index
    %c0_9 = arith.constant 0 : index
    %21 = vector.load %arg6[%c256, %c0_9] : memref<264x128xf32, #tpu.memory_space<vmem>>, vector<8x128xf32>
    tpu.vector_store %arg6[%c256, %c0_9], %20 {strides = array<i32>} : memref<264x128xf32, #tpu.memory_space<vmem>>, vector<8x128xf32>,
    %c1 = arith.constant 1 : index
    %c0_10 = arith.constant 0 : index
    %22 = vector.load %arg6[%c1, %c0_10] : memref<264x128xf32, #tpu.memory_space<vmem>>, vector<256x128xf32>
    %23 = vector.extract_strided_slice %17 {offsets = [0, 128], sizes = [256, 128], strides = [1, 1]} : vector<256x256xf32> to vector<256x128xf32>
    %24 = arith.addf %22, %23 : vector<256x128xf32>
    %c1_11 = arith.constant 1 : index
    %c0_12 = arith.constant 0 : index
    %25 = vector.load %arg6[%c1_11, %c0_12] : memref<264x128xf32, #tpu.memory_space<vmem>>, vector<256x128xf32>
    tpu.vector_store %arg6[%c1_11, %c0_12], %24 {strides = array<i32>} : memref<264x128xf32, #tpu.memory_space<vmem>>, vector<256x128xf32>,
    %c0_13 = arith.constant 0 : index
    %c0_14 = arith.constant 0 : index
    %26 = vector.load %arg6[%c0_13, %c0_14] : memref<264x128xf32, #tpu.memory_space<vmem>>, vector<1x128xf32>
    %c0_15 = arith.constant 0 : index
    %c0_16 = arith.constant 0 : index
    %27 = vector.load %arg7[%c0_15, %c0_16] : memref<8x128xf32, #tpu.memory_space<vmem>>, vector<1x128xf32>
    %28 = arith.addf %26, %27 : vector<1x128xf32>
    %c0_17 = arith.constant 0 : index
    %c0_18 = arith.constant 0 : index
    %29 = vector.load %arg6[%c0_17, %c0_18] : memref<264x128xf32, #tpu.memory_space<vmem>>, vector<1x128xf32>
    tpu.vector_store %arg6[%c0_17, %c0_18], %28 {strides = array<i32>} : memref<264x128xf32, #tpu.memory_space<vmem>>, vector<1x128xf32>,
    %30 = tpu.iota {dimensions = array<i32: 0>} : vector<256x1xi32>
    %c256_i32_19 = arith.constant 256 : i32
    %31 = arith.muli %arg1, %c256_i32_19 : i32
    %32 = vector.broadcast %31 : i32 to vector<256x1xi32>
    %33 = arith.addi %30, %32 : vector<256x1xi32>
    %c1_20 = arith.constant 1 : index
    %c0_21 = arith.constant 0 : index
    %34 = vector.load %arg4[%c1_20, %c0_21] : memref<3x128xf32, #tpu.memory_space<vmem>>, vector<1x128xf32>
    %35 = vector.shape_cast %34 : vector<1x128xf32> to vector<1x128xf32>
    %36 = vector.broadcast %35 : vector<1x128xf32> to vector<256x128xf32>
    %c0_i32_22 = arith.constant 0 : i32
    %37 = vector.broadcast %c0_i32_22 : i32 to vector<256x1xi32>
    %38 = arith.cmpi eq, %33, %37 : vector<256x1xi32>
    %c0_23 = arith.constant 0 : index
    %c0_24 = arith.constant 0 : index
    %39 = vector.load %arg4[%c0_23, %c0_24] : memref<3x128xf32, #tpu.memory_space<vmem>>, vector<1x128xf32>
    %40 = vector.shape_cast %38 : vector<256x1xi1> to vector<256x1xi1>
    %41 = vector.broadcast %40 : vector<256x1xi1> to vector<256x128xi1>
    %42 = vector.shape_cast %39 : vector<1x128xf32> to vector<1x128xf32>
    %43 = vector.broadcast %42 : vector<1x128xf32> to vector<256x128xf32>
    %44 = arith.select %41, %43, %36 : vector<256x128xi1>, vector<256x128xf32>
    %c8_i32_25 = arith.constant 8 : i32
    %45 = vector.broadcast %c8_i32_25 : i32 to vector<256x1xi32>
    %46 = arith.cmpi eq, %33, %45 : vector<256x1xi32>
    %c2 = arith.constant 2 : index
    %c0_26 = arith.constant 0 : index
    %47 = vector.load %arg4[%c2, %c0_26] : memref<3x128xf32, #tpu.memory_space<vmem>>, vector<1x128xf32>
    %48 = vector.shape_cast %46 : vector<256x1xi1> to vector<256x1xi1>
    %49 = vector.broadcast %48 : vector<256x1xi1> to vector<256x128xi1>
    %50 = vector.shape_cast %47 : vector<1x128xf32> to vector<1x128xf32>
    %51 = vector.broadcast %50 : vector<1x128xf32> to vector<256x128xf32>
    %52 = arith.select %49, %51, %44 : vector<256x128xi1>, vector<256x128xf32>
    %c0_27 = arith.constant 0 : index
    %c0_28 = arith.constant 0 : index
    %53 = vector.load %arg6[%c0_27, %c0_28] : memref<264x128xf32, #tpu.memory_space<vmem>>, vector<256x128xf32>
    %54 = arith.mulf %53, %52 : vector<256x128xf32>
    %c0_29 = arith.constant 0 : index
    %c0_30 = arith.constant 0 : index
    %c0_31 = arith.constant 0 : index
    %55 = vector.load %arg5[%c0_29, %c0_30, %c0_31] : memref<1x256x128xf32, #tpu.memory_space<vmem>>, vector<1x256x128xf32>
    %56 = vector.shape_cast %55 : vector<1x256x128xf32> to vector<256x128xf32>
    %57 = vector.shape_cast %54 : vector<256x128xf32> to vector<1x256x128xf32>
    tpu.vector_store %arg5[%c0_29, %c0_30, %c0_31], %57 {strides = array<i32>} : memref<1x256x128xf32, #tpu.memory_space<vmem>>, vector<1x256x128xf32>,
    %c256_32 = arith.constant 256 : index
    %c0_33 = arith.constant 0 : index
    %58 = vector.load %arg6[%c256_32, %c0_33] : memref<264x128xf32, #tpu.memory_space<vmem>>, vector<1x128xf32>
    %c0_34 = arith.constant 0 : index
    %c0_35 = arith.constant 0 : index
    %59 = vector.load %arg7[%c0_34, %c0_35] : memref<8x128xf32, #tpu.memory_space<vmem>>, vector<1x128xf32>
    tpu.vector_store %arg7[%c0_34, %c0_35], %58 {strides = array<i32>} : memref<8x128xf32, #tpu.memory_space<vmem>>, vector<1x128xf32>,
    return
  }
  func.func @transform_0(%arg0: i32, %arg1: i32) -> (i32, i32, i32) {
    %c0_i32 = arith.constant 0 : i32
    %0 = arith.minsi %arg1, %c0_i32 : i32
    %c0_i32_0 = arith.constant 0 : i32
    %c0_i32_1 = arith.constant 0 : i32
    return %arg0, %c0_i32_0, %0 : i32, i32, i32
  }
  func.func @transform_1(%arg0: i32, %arg1: i32) -> (i32, i32) {
    %c0_i32 = arith.constant 0 : i32
    %c0_i32_0 = arith.constant 0 : i32
    %c0_i32_1 = arith.constant 0 : i32
    return %c0_i32, %c0_i32_0 : i32, i32
  }
  func.func @transform_2(%arg0: i32, %arg1: i32) -> (i32, i32) {
    %c0_i32 = arith.constant 0 : i32
    %c0_i32_0 = arith.constant 0 : i32
    %c0_i32_1 = arith.constant 0 : i32
    return %c0_i32, %c0_i32_0 : i32, i32
  }
  func.func @transform_3(%arg0: i32, %arg1: i32) -> (i32, i32, i32) {
    %c0_i32 = arith.constant 0 : i32
    %c0_i32_0 = arith.constant 0 : i32
    return %arg0, %arg1, %c0_i32 : i32, i32, i32
  }
}

</mosaic_0001>

<bundles_post_ra>
// kernel: tpu_custom_call.1
= control target key start
LH: loop header
LB: loop body
LE: loop exit
PB: predicated region body
PF: predicated region fallthrough
CT: control target
= control target key end

     0   :  { %8 = vsyncpa [#allocation5], 0  ;;  %s1673_s0 = inlined_call_operand.vmem [shape: f32[2,18,256], index: 0, kind: input, shape index: {}]   ;;  %s1674_s1 = inlined_call_operand.vmem [shape: bf16[18,256], index: 1, kind: input, shape index: {}]   ;;  %s1675_s2 = inlined_call_operand.vmem [shape: f32[3,128], index: 2, kind: input, shape index: {}]   ;;  %s1676_s3 = inlined_call_operand.hbm [shape: f32[2,256,128], index: 3, kind: output, shape index: {}]  }
   0x1   :  { %10 = vsyncpa [#allocation5 + $0x1], 0  ;;  %s1422_s12 = smov 0   ;;  %s1424_s13 = smov 0  }
   0x2   :  { %s1426_s14 = smov 0   ;;  %s1428_s15 = smov 0  }
   0x3   :  { %s1430_s16 = smov 0   ;;  %s1432_s17 = smov 0  }
   0x4 LB: > { %s1210_s18 = sadd.s32 4294967295, %s1395_s17   ;;  %s1211_s19 = sadd.s32 4294967294, %s1395_s17   ;;  %s1395_s17 = sphi %s1432_s17, %s16_s17   ;;  %s1391_s16 = sphi %s1430_s16, %s1683_s16   ;;  %s1387_s15 = sphi %s1428_s15, %s1682_s15   ;;  %s1383_s14 = sphi %s1426_s14, %s1681_s14   ;;  %s1379_s13 = sphi %s1424_s13, %s1680_s13   ;;  %s1375_s12 = sphi %s1422_s12, %s1679_s12  }
   0x5   : > { %s28_s20 = sadd.s32 1, %s1391_s16  ;;  %s111_s21 = sadd.s32 1, %s1383_s14 }
   0x6   : > { %p30_p0 = scmp.ge.s32.totalorder %s28_s20, 2  ;;  %p121_p1 = scmp.ne.s32.totalorder %s1383_s14, %s1379_s13 }
   0x7   : > { %p122_p2 = scmp.eq.s32.totalorder %s1210_s18, 1  ;;  %p127_p3 = scmp.ne.s32.totalorder %s1379_s13, %s1375_s12 }
   0x8   : > { %s1685_s20 = smov (%p30_p0, %s28_s20), 0  ;;  %p128_p5 = scmp.eq.s32.totalorder %s1211_s19, 1 }
   0x9   : > { %p1462_p4 = por %p122_p2, %p121_p1  ;;  %s106_s23 = ssub.s32 %s1391_s16, %s1685_s20 }
   0xa   : > { %p1214_p6 = scmp.ge.s32.totalorder %s1395_s17, 1  ;;  %p109_p7 = scmp.eq.s32.totalorder %s106_s23, 0 }
   0xb   : > { %p1469_p8 = por %p128_p5, %p127_p3  ;;  %p169_p9 = scmp.lt.s32.totalorder %s1395_s17, 3 }
   0xc   : > { %s1475_s25 = scalar_select %p109_p7, %s1383_s14, %s111_s21  }
   0xd   : > { %p170_p10 = pnand %p1214_p6, %p169_p9 }
   0xe   : > { %p202_p11 = scmp.lt.s32.totalorder (!%p170_p10), %s1387_s15, 1  ;;  %v220_v0 = vlaneseq (!%p170_p10)  ;;  %v1312_v1 = vld [vmem:[%s1674_s1 + $0x4] ss:$8 sps:$4 sm:$0xff] (!%p170_p10)   ;;  %v1314_v3 = vld [vmem:[%s1674_s1] ss:$8 sps:$4 sm:$0xff] (!%p170_p10)   ;;  %vm348_vm0 = vcmask (!%p170_p10), 1040384  }
   0xf   : > { %173 = sbr.rel (%p170_p10) target bundleno = 441 (0x1b9), region = 32  ;;  %1247 = vmatprep.subr.bf16.mxu1 (!%p170_p10), %v1312_v1  ;;  %v251_v4 = vld [vmem:[%s1674_s1 + $0x10] sm:$0x11] (!%p170_p10)  ;;  %v1397_v5 = vmov (!%p170_p10), 0   ;;  %355 = vmatprep.subr.bf16.mxu0 (!%p170_p10), %v1312_v1  ;;  %vm299_vm2 = vcmask (!%p170_p10), 146432   ;;  %v1398_v20 = vmov (!%p170_p10), 0.0  }
  0x10   : > { %v221_v2 = vand.u32 (!%p170_p10), 127, %v220_v0  ;;  %467 = vmatprep.mubr.bf16.mxu1 (!%p170_p10), %v1397_v5  ;;  %1249 = vmatpush1.bf16.msra.mxu1 (!%p170_p10), %v1314_v3  ;;  %v1220_v6 = vcombine.high (!%p170_p10), %v251_v4, %v251_v4  ;;  %v1219_v7 = vcombine.low (!%p170_p10), %v251_v4, %v251_v4  ;;  %219 = vst [vmem:[#allocation3] sm:$0xff] (!%p170_p10), %v1398_v20  ;;  %580 = vst [vmem:[#allocation2 + $0x100] sm:$0xff] (!%p170_p10), %v1398_v20  ;;  %s196_s10 = sand.u32 (!%p170_p10), 1, %s1379_s13   ;;  %v1541_v44 = vld [vmem:[%s1675_s2 + $0x1] ss:$0 sm:$0xff] (!%p170_p10) }
  0x11   : > { %356 = vmatpush1.bf16.msra.mxu0 (!%p170_p10), %v1314_v3  ;;  %387 = vmatprep.mubr.bf16.mxu0 (!%p170_p10), %v1397_v5  ;;  %s1215_s11 = sshll.u32 (!%p170_p10), %s196_s10, 8  ;;  %s1246_s29 = sshll.u32 (!%p170_p10), %s1387_s15, 12 }
  0x12   : > { %vm227_vm1 = vcmp.lt.s32.totalorder (!%p170_p10), %v221_v2, 8  ;;  %1248 = vmatprep.subr.msk.bf16.mxu1 (!%p170_p10), %vm348_vm0, %v1220_v6  ;;  %1221 = vmatprep.subr.msk.bf16.mxu0 (!%p170_p10), %vm348_vm0, %v1220_v6  ;;  %v350_v11 = vsel (!%p170_p10), %vm348_vm0, %v1219_v7, 0  ;;  %s1544_s21 = scalar_lea.vmem (!%p170_p10), [#allocation4], %s1215_s11  ;;  %s1399_s8 = smov (!%p170_p10), [#allocation4]  }
  0x13   : > { %s1131_s30 = sshll.u32 (!%p170_p10), %s1544_s21, 4  ;;  %s1616_s30 = int_to_ptr.vmem [resolvable:$true] %s1131_s30 }
  0x14   : > { %1250 = vmatpush1.bf16.msra.mxu1 (!%p170_p10), %v350_v11  ;;  %s1317_s7 = scalar_lea.vmem (!%p170_p10), %s1616_s30, 4096 }
  0x15   : > { %358 = vmatpush1.bf16.msra.mxu0 (!%p170_p10), %v350_v11  ;;  %p1318_p12 = scmp.ne.s32.totalorder (!%p170_p10), %s1616_s30, %s1317_s7 }
  0x16   : > { %s203_s28 = scalar_select %p202_p11, %s1387_s15, 1 }
  0x17   : > { %1230 = vmatmul.mubr.msk.bf16.vlgmr.msra.gmra.mrb[0].mxu1 %vm299_vm2, %v1397_v5  ;;  %s1627_s15 = scalar_lea.sflag [#allocation5], %s196_s10  ;;  %p1319_p13 = pnand %p1318_p12, %p1462_p4 }
  0x18   : > { %s1251_s6 = smul.u32 48, %s203_s28  ;;  %477 = vmatprep.mubr.bf16.mxu1 %v1397_v5 }
  0x19   : > { %p1320_p0 = pneg %p1319_p13 }
  0x1a   : > { %s209_s9 = scalar_lea.vmem %s1673_s0, %s1251_s6  ;;  %s1614_s6 = scalar_lea.hbm %s1676_s3, %s1246_s29 }
  0x1b   : > { %v229_v8 = vld [vmem:[%s209_s9] sm:$0xff]  ;;  %v231_v9 = vld [vmem:[%s209_s9 + $0x10] sm:$0xff] }
  0x1c   : > { %v233_v10 = vld [vmem:[%s209_s9 + $0x20] sm:$0x3]  ;;  %v239_v12 = vsel %vm227_vm1, %v229_v8, 0.0  ;;  %v241_v13 = vsel %vm227_vm1, %v231_v9, 0.0  ;;  %s1321_s9 = sshll.u32 %s1399_s8, 4  ;;  %s1322_s9 = int_to_ptr.vmem [resolvable:$false] %s1321_s9 }
  0x1d   : > { %v243_v14 = vsel %vm227_vm1, %v233_v10, 0.0  ;;  %v245_v15 = vpack.c.bf16 %v241_v13, %v239_v12  ;;  %s1323_s11 = scalar_lea.vmem %s1322_s9, 8192  ;;  %p1324_p1 = scmp.lt.s32.totalorder %s1616_s30, %s1322_s9 }
  0x1e   : > { %v247_v16 = vpack.c.bf16 %v243_v14, %v243_v14  ;;  %p1325_p2 = scmp.lt.s32.totalorder %s1323_s11, %s1317_s7 }
  0x1f   : > { %252 = vxpose.xlu0.c.b16.start [1/2] (short) %v245_v15, 128  ;;  %1231 = vmatmul.mubr.msk.bf16.gmra.mrb[4].mxu1 %vm299_vm2, %v1397_v5 }
  0x20   : > { %487 = vmatprep.mubr.bf16.mxu1 %v1397_v5  ;;  %p1326_p3 = por %p1325_p2, %p1324_p1 }
  0x22   : > { %p1327_p5 = pnand %p1326_p3, %p1320_p0 }
  0x23   : > { %253 = vxpose.xlu0.c.b16.end [2/2] (short) %v247_v16, 128 }
  0x27   : > { %1232 = vmatmul.mubr.msk.bf16.gmra.mrb[8].mxu1 %vm299_vm2, %v1397_v5 }
  0x28   : > { %497 = vmatprep.mubr.bf16.mxu1 %v1397_v5 }
  0x2f   : > { %1233 = vmatmul.mubr.msk.bf16.gmra.mrb[12].mxu1 %vm299_vm2, %v1397_v5 }
  0x30   : > { %507 = vmatprep.mubr.bf16.mxu1 %v1397_v5 }
  0x37   : > { %1234 = vmatmul.mubr.msk.bf16.gmra.mrb[16].mxu1 %vm299_vm2, %v1397_v5 }
  0x38   : > { %517 = vmatprep.mubr.bf16.mxu1 %v1397_v5 }
  0x3f   : > { %1235 = vmatmul.mubr.msk.bf16.gmra.mrb[20].mxu1 %vm299_vm2, %v1397_v5 }
  0x40   : > { %527 = vmatprep.mubr.bf16.mxu1 %v1397_v5 }
  0x47   : > { %1236 = vmatmul.mubr.msk.bf16.gmra.mrb[24].mxu1 %vm299_vm2, %v1397_v5 }
  0x48   : > { %537 = vmatprep.mubr.bf16.mxu1 %v1397_v5 }
  0x4f   : > { %1237 = vmatmul.mubr.msk.bf16.gmra.mrb[28].mxu1 %vm299_vm2, %v1397_v5 }
  0x85   : > { %v260_v17 = vpop.trf.xlu0 }
  0x86   : > { %1222 = vmatmul.mubr.msk.bf16.vlgmr.msra.gmra.mrb[0].mxu0 %vm299_vm2, %v260_v17 }
  0x87   : > { %397 = vmatprep.mubr.bf16.mxu0 %v1397_v5 }
  0x89   : > { %v261_v18 = vpop.trf.xlu0 }
  0x8d   : > { %v262_v19 = vpop.trf.xlu0 }
  0x8e   : > { %1223 = vmatmul.mubr.msk.bf16.gmra.mrb[4].mxu0 %vm299_vm2, %v261_v18 }
  0x8f   : > { %407 = vmatprep.mubr.bf16.mxu0 %v1397_v5 }
  0x91   : > { %v263_v21 = vpop.trf.xlu0 }
  0x95   : > { %v264_v22 = vpop.trf.xlu0 }
  0x96   : > { %1224 = vmatmul.mubr.msk.bf16.gmra.mrb[8].mxu0 %vm299_vm2, %v262_v19 }
  0x97   : > { %417 = vmatprep.mubr.bf16.mxu0 %v1397_v5 }
  0x99   : > { %v265_v23 = vpop.trf.xlu0 }
  0x9d   : > { %v266_v24 = vpop.trf.xlu0 }
  0x9e   : > { %1225 = vmatmul.mubr.msk.bf16.gmra.mrb[12].mxu0 %vm299_vm2, %v263_v21 }
  0x9f   : > { %427 = vmatprep.mubr.bf16.mxu0 %v1397_v5 }
  0xa1   : > { %v267_v25 = vpop.trf.xlu0 }
  0xa6   : > { %1226 = vmatmul.mubr.msk.bf16.gmra.mrb[16].mxu0 %vm299_vm2, %v264_v22 }
  0xa7   : > { %437 = vmatprep.mubr.bf16.mxu0 %v1397_v5 }
  0xae   : > { %1227 = vmatmul.mubr.msk.bf16.gmra.mrb[20].mxu0 %vm299_vm2, %v265_v23 }
  0xaf   : > { %447 = vmatprep.mubr.bf16.mxu0 %v1397_v5 }
  0xb6   : > { %1228 = vmatmul.mubr.msk.bf16.gmra.mrb[24].mxu0 %vm299_vm2, %v266_v24 }
  0xb7   : > { %457 = vmatprep.mubr.bf16.mxu0 %v1397_v5 }
  0xbe   : > { %1229 = vmatmul.mubr.msk.bf16.gmra.mrb[28].mxu0 %vm299_vm2, %v267_v25 }
  0xea   : > { %v469_v26 = vpop.f32.mrb[0].mxu1 }
  0xeb   : > { %564 = vst [vmem:[#allocation2 + $0x80] sm:$0xff] %v469_v26  ;;  %v471_v27 = vpop.f32.mrb[1].mxu1 }
  0xec   : > { %v473_v28 = vpop.f32.mrb[2].mxu1 }
  0xed   : > { %565 = vst [vmem:[#allocation2 + $0x88] sm:$0xff] %v473_v28  ;;  %v475_v29 = vpop.f32.mrb[3].mxu1 }
  0xf2   : > { %v479_v30 = vpop.f32.mrb[4].mxu1 }
  0xf3   : > { %566 = vst [vmem:[#allocation2 + $0x90] sm:$0xff] %v479_v30  ;;  %v481_v31 = vpop.f32.mrb[5].mxu1 }
  0xf4   : > { %v597_v32 = vld [vmem:[#allocation2 + $0x81] sm:$0xff]  ;;  %v483_v33 = vpop.f32.mrb[6].mxu1 }
  0xf5   : > { %v629_v34 = vadd.f32 %v597_v32, %v471_v27  ;;  %567 = vst [vmem:[#allocation2 + $0x98] sm:$0xff] %v483_v33  ;;  %v485_v35 = vpop.f32.mrb[7].mxu1 }
  0xf7   : > { %661 = vst [vmem:[#allocation2 + $0x81] sm:$0xff] %v629_v34 }
  0xfa   : > { %v598_v36 = vld [vmem:[#allocation2 + $0x89] sm:$0xff]  ;;  %v489_v37 = vpop.f32.mrb[8].mxu1 }
  0xfb   : > { %v630_v38 = vadd.f32 %v598_v36, %v475_v29  ;;  %568 = vst [vmem:[#allocation2 + $0xa0] sm:$0xff] %v489_v37  ;;  %v491_v39 = vpop.f32.mrb[9].mxu1 }
  0xfc   : > { %v599_v40 = vld [vmem:[#allocation2 + $0x91] sm:$0xff]  ;;  %v493_v41 = vpop.f32.mrb[10].mxu1 }
  0xfd   : > { %662 = vst [vmem:[#allocation2 + $0x89] sm:$0xff] %v630_v38  ;;  %v631_v42 = vadd.f32 %v599_v40, %v481_v31  ;;  %569 = vst [vmem:[#allocation2 + $0xa8] sm:$0xff] %v493_v41  ;;  %v495_v43 = vpop.f32.mrb[11].mxu1 }
  0xff   : > { %663 = vst [vmem:[#allocation2 + $0x91] sm:$0xff] %v631_v42 }
 0x102   : > { %v600_v45 = vld [vmem:[#allocation2 + $0x99] sm:$0xff]  ;;  %v499_v46 = vpop.f32.mrb[12].mxu1 }
 0x103   : > { %v632_v47 = vadd.f32 %v600_v45, %v485_v35  ;;  %570 = vst [vmem:[#allocation2 + $0xb0] sm:$0xff] %v499_v46  ;;  %v501_v48 = vpop.f32.mrb[13].mxu1 }
 0x104   : > { %v1034_v49 = vld [vmem:[#allocation2 + $0x88] sm:$0xff]  ;;  %v503_v51 = vpop.f32.mrb[14].mxu1 }
 0x105   : > { %v601_v50 = vld [vmem:[#allocation2 + $0xa1] sm:$0xff]  ;;  %v1066_v52 = vmul.f32 %v1541_v44, %v1034_v49  ;;  %664 = vst [vmem:[#allocation2 + $0x99] sm:$0xff] %v632_v47  ;;  %571 = vst [vmem:[#allocation2 + $0xb8] sm:$0xff] %v503_v51  ;;  %v505_v54 = vpop.f32.mrb[15].mxu1 }
 0x106   : > { %v633_v53 = vadd.f32 %v601_v50, %v491_v39  ;;  %v1035_v55 = vld [vmem:[#allocation2 + $0x90] sm:$0xff] }
 0x107   : > { %1098 = vst [vmem:[%s1544_s21 + $0x88] sm:$0xff] %v1066_v52  ;;  %v1067_v56 = vmul.f32 %v1541_v44, %v1035_v55 }
 0x108   : > { %665 = vst [vmem:[#allocation2 + $0xa1] sm:$0xff] %v633_v53 }
 0x109   : > { %1099 = vst [vmem:[%s1544_s21 + $0x90] sm:$0xff] %v1067_v56 }
 0x10a   : > { %v602_v57 = vld [vmem:[#allocation2 + $0xa9] sm:$0xff]  ;;  %v509_v58 = vpop.f32.mrb[16].mxu1 }
 0x10b   : > { %v634_v59 = vadd.f32 %v602_v57, %v495_v43  ;;  %572 = vst [vmem:[#allocation2 + $0xc0] sm:$0xff] %v509_v58  ;;  %v511_v60 = vpop.f32.mrb[17].mxu1 }
 0x10c   : > { %v1036_v61 = vld [vmem:[#allocation2 + $0x98] sm:$0xff]  ;;  %v513_v63 = vpop.f32.mrb[18].mxu1 }
 0x10d   : > { %v603_v62 = vld [vmem:[#allocation2 + $0xb1] sm:$0xff]  ;;  %v1068_v1 = vmul.f32 %v1541_v44, %v1036_v61  ;;  %666 = vst [vmem:[#allocation2 + $0xa9] sm:$0xff] %v634_v59  ;;  %573 = vst [vmem:[#allocation2 + $0xc8] sm:$0xff] %v513_v63  ;;  %v515_v3 = vpop.f32.mrb[19].mxu1 }
 0x10e   : > { %v635_v2 = vadd.f32 %v603_v62, %v501_v48 }
 0x10f   : > { %v1037_v4 = vld [vmem:[#allocation2 + $0xa0] sm:$0xff]  ;;  %1100 = vst [vmem:[%s1544_s21 + $0x98] sm:$0xff] %v1068_v1 }
 0x110   : > { %v1069_v5 = vmul.f32 %v1541_v44, %v1037_v4  ;;  %667 = vst [vmem:[#allocation2 + $0xb1] sm:$0xff] %v635_v2 }
 0x112   : > { %1101 = vst [vmem:[%s1544_s21 + $0xa0] sm:$0xff] %v1069_v5  ;;  %v604_v6 = vld [vmem:[#allocation2 + $0xb9] sm:$0xff]  ;;  %v519_v7 = vpop.f32.mrb[20].mxu1 }
 0x113   : > { %v636_v8 = vadd.f32 %v604_v6, %v505_v54  ;;  %574 = vst [vmem:[#allocation2 + $0xd0] sm:$0xff] %v519_v7  ;;  %v521_v9 = vpop.f32.mrb[21].mxu1  ;;  %v678_v54 = vld [vmem:[#allocation3] sm:$0x1] }
 0x114   : > { %v1038_v10 = vld [vmem:[#allocation2 + $0xa8] sm:$0xff]  ;;  %v523_v12 = vpop.f32.mrb[22].mxu1 }
 0x115   : > { %v605_v11 = vld [vmem:[#allocation2 + $0xc1] sm:$0xff]  ;;  %v1070_v13 = vmul.f32 %v1541_v44, %v1038_v10  ;;  %668 = vst [vmem:[#allocation2 + $0xb9] sm:$0xff] %v636_v8  ;;  %575 = vst [vmem:[#allocation2 + $0xd8] sm:$0xff] %v523_v12  ;;  %v525_v15 = vpop.f32.mrb[23].mxu1  ;;  %v682_v8 = vshrl.u32 %v220_v0, 7 }
 0x116   : > { %v637_v14 = vadd.f32 %v605_v11, %v511_v60  ;;  %v1239_v11 = vld [vmem:[%s1675_s2] ss:$0 sm:$0xff] }
 0x117   : > { %v1039_v16 = vld [vmem:[#allocation2 + $0xb0] sm:$0xff]  ;;  %1102 = vst [vmem:[%s1544_s21 + $0xa8] sm:$0xff] %v1070_v13  ;;  %vm751_vm3 = vcmp.eq.s32.totalorder %v682_v8, 0 }
 0x118   : > { %v1071_v17 = vmul.f32 %v1541_v44, %v1039_v16  ;;  %669 = vst [vmem:[#allocation2 + $0xc1] sm:$0xff] %v637_v14  ;;  %v683_v14 = vadd.s32 8, %v682_v8 }
 0x11a   : > { %1103 = vst [vmem:[%s1544_s21 + $0xb0] sm:$0xff] %v1071_v17  ;;  %v606_v18 = vld [vmem:[#allocation2 + $0xc9] sm:$0xff]  ;;  %v529_v19 = vpop.f32.mrb[24].mxu1  ;;  %v852_v17 = vsel %vm751_vm3, %v1239_v11, %v1541_v44  ;;  %vm885_vm4 = vcmp.eq.s32.totalorder %v683_v14, 8 }
 0x11b   : > { %v638_v20 = vadd.f32 %v606_v18, %v515_v3  ;;  %576 = vst [vmem:[#allocation2 + $0xe0] sm:$0xff] %v529_v19  ;;  %v531_v21 = vpop.f32.mrb[25].mxu1 }
 0x11c   : > { %v1040_v22 = vld [vmem:[#allocation2 + $0xb8] sm:$0xff]  ;;  %v533_v24 = vpop.f32.mrb[26].mxu1 }
 0x11d   : > { %v607_v23 = vld [vmem:[#allocation2 + $0xd1] sm:$0xff]  ;;  %v1072_v25 = vmul.f32 %v1541_v44, %v1040_v22  ;;  %670 = vst [vmem:[#allocation2 + $0xc9] sm:$0xff] %v638_v20  ;;  %577 = vst [vmem:[#allocation2 + $0xe8] sm:$0xff] %v533_v24  ;;  %v535_v27 = vpop.f32.mrb[27].mxu1  ;;  %v1240_v22 = vld [vmem:[%s1675_s2 + $0x2] ss:$0 sm:$0xff] }
 0x11e   : > { %v639_v26 = vadd.f32 %v607_v23, %v521_v9  ;;  %v986_v24 = vsel %vm885_vm4, %v1240_v22, %v1541_v44 }
 0x11f   : > { %v1041_v28 = vld [vmem:[#allocation2 + $0xc0] sm:$0xff]  ;;  %1104 = vst [vmem:[%s1544_s21 + $0xb8] sm:$0xff] %v1072_v25 }
 0x120   : > { %v1073_v29 = vmul.f32 %v1541_v44, %v1041_v28  ;;  %671 = vst [vmem:[#allocation2 + $0xd1] sm:$0xff] %v639_v26 }
 0x122   : > { %1105 = vst [vmem:[%s1544_s21 + $0xc0] sm:$0xff] %v1073_v29  ;;  %v608_v30 = vld [vmem:[#allocation2 + $0xd9] sm:$0xff]  ;;  %v539_v31 = vpop.f32.mrb[28].mxu1 }
 0x123   : > { %v640_v32 = vadd.f32 %v608_v30, %v525_v15  ;;  %578 = vst [vmem:[#allocation2 + $0xf0] sm:$0xff] %v539_v31  ;;  %v541_v33 = vpop.f32.mrb[29].mxu1 }
 0x124   : > { %v1042_v34 = vld [vmem:[#allocation2 + $0xc8] sm:$0xff]  ;;  %v543_v36 = vpop.f32.mrb[30].mxu1 }
 0x125   : > { %v609_v35 = vld [vmem:[#allocation2 + $0xe1] sm:$0xff]  ;;  %v1074_v37 = vmul.f32 %v1541_v44, %v1042_v34  ;;  %672 = vst [vmem:[#allocation2 + $0xd9] sm:$0xff] %v640_v32  ;;  %579 = vst [vmem:[#allocation2 + $0xf8] sm:$0xff] %v543_v36  ;;  %v545_v39 = vpop.f32.mrb[31].mxu1 }
 0x126   : > { %v641_v38 = vadd.f32 %v609_v35, %v531_v21 }
 0x127   : > { %v1043_v40 = vld [vmem:[#allocation2 + $0xd0] sm:$0xff]  ;;  %1106 = vst [vmem:[%s1544_s21 + $0xc8] sm:$0xff] %v1074_v37 }
 0x128   : > { %v1075_v41 = vmul.f32 %v1541_v44, %v1043_v40  ;;  %673 = vst [vmem:[#allocation2 + $0xe1] sm:$0xff] %v641_v38 }
 0x12a   : > { %1107 = vst [vmem:[%s1544_s21 + $0xd0] sm:$0xff] %v1075_v41  ;;  %v610_v42 = vld [vmem:[#allocation2 + $0xe9] sm:$0xff] }
 0x12b   : > { %v642_v43 = vadd.f32 %v610_v42, %v535_v27 }
 0x12c   : > { %v1044_v45 = vld [vmem:[#allocation2 + $0xd8] sm:$0xff] }
 0x12d   : > { %v611_v46 = vld [vmem:[#allocation2 + $0xf1] sm:$0xff]  ;;  %v612_v47 = vld [vmem:[#allocation2 + $0xf9] sm:$0xff]  ;;  %v1076_v48 = vmul.f32 %v1541_v44, %v1044_v45  ;;  %674 = vst [vmem:[#allocation2 + $0xe9] sm:$0xff] %v642_v43 }
 0x12e   : > { %v643_v49 = vadd.f32 %v611_v46, %v541_v33  ;;  %v644_v50 = vadd.f32 %v612_v47, %v545_v39 }
 0x12f   : > { %v1045_v51 = vld [vmem:[#allocation2 + $0xe0] sm:$0xff]  ;;  %1108 = vst [vmem:[%s1544_s21 + $0xd8] sm:$0xff] %v1076_v48 }
 0x130   : > { %v1077_v52 = vmul.f32 %v1541_v44, %v1045_v51  ;;  %675 = vst [vmem:[#allocation2 + $0xf1] sm:$0xff] %v643_v49  ;;  %676 = vst [vmem:[#allocation2 + $0xf9] sm:$0xff] %v644_v50 }
 0x132   : > { %1109 = vst [vmem:[%s1544_s21 + $0xe0] sm:$0xff] %v1077_v52 }
 0x134   : > { %v1046_v53 = vld [vmem:[#allocation2 + $0xe8] sm:$0xff] }
 0x135   : > { %v1078_v55 = vmul.f32 %v1541_v44, %v1046_v53 }
 0x137   : > { %v1047_v56 = vld [vmem:[#allocation2 + $0xf0] sm:$0xff]  ;;  %v1048_v57 = vld [vmem:[#allocation2 + $0xf8] sm:$0xff]  ;;  %v1113_v58 = vld [vmem:[#allocation2 + $0x100] sm:$0x1]  ;;  %1110 = vst [vmem:[%s1544_s21 + $0xe8] sm:$0xff] %v1078_v55 }
 0x138   : > { %v1079_v59 = vmul.f32 %v1541_v44, %v1047_v56  ;;  %v1080_v60 = vmul.f32 %v1541_v44, %v1048_v57  ;;  %1114 = vst [vmem:[#allocation3] sm:$0x1] %v1113_v58 }
 0x13a   : > { %1111 = vst [vmem:[%s1544_s21 + $0xf0] sm:$0xff] %v1079_v59  ;;  %1112 = vst [vmem:[%s1544_s21 + $0xf8] sm:$0xff] %v1080_v60 }
 0x159   : > { %v389_v61 = vpop.f32.mrb[0].mxu0 }
 0x15a   : > { %548 = vst [vmem:[#allocation2] sm:$0xff] %v389_v61  ;;  %v391_v62 = vpop.f32.mrb[1].mxu0 }
 0x15b   : > { %v393_v63 = vpop.f32.mrb[2].mxu0 }
 0x15c   : > { %549 = vst [vmem:[#allocation2 + $0x8] sm:$0xff] %v393_v63  ;;  %v395_v1 = vpop.f32.mrb[3].mxu0 }
 0x161   : > { %v677_v2 = vld [vmem:[#allocation2] sm:$0x1]  ;;  %v399_v3 = vpop.f32.mrb[4].mxu0 }
 0x162   : > { %v679_v4 = vadd.f32 %v678_v54, %v677_v2  ;;  %550 = vst [vmem:[#allocation2 + $0x10] sm:$0xff] %v399_v3  ;;  %v401_v5 = vpop.f32.mrb[5].mxu0 }
 0x163   : > { %v581_v6 = vld [vmem:[#allocation2 + $0x1] sm:$0xff]  ;;  %v403_v7 = vpop.f32.mrb[6].mxu0 }
 0x164   : > { %680 = vst [vmem:[#allocation2] sm:$0x1] %v679_v4  ;;  %v613_v9 = vadd.f32 %v581_v6, %v391_v62  ;;  %551 = vst [vmem:[#allocation2 + $0x18] sm:$0xff] %v403_v7  ;;  %v405_v10 = vpop.f32.mrb[7].mxu0 }
 0x166   : > { %645 = vst [vmem:[#allocation2 + $0x1] sm:$0xff] %v613_v9 }
 0x169   : > { %v582_v12 = vld [vmem:[#allocation2 + $0x9] sm:$0xff]  ;;  %v409_v13 = vpop.f32.mrb[8].mxu0 }
 0x16a   : > { %v614_v15 = vadd.f32 %v582_v12, %v395_v1  ;;  %552 = vst [vmem:[#allocation2 + $0x20] sm:$0xff] %v409_v13  ;;  %v411_v16 = vpop.f32.mrb[9].mxu0 }
 0x16b   : > { %v583_v0 = vld [vmem:[#allocation2 + $0x11] sm:$0xff]  ;;  %v413_v18 = vpop.f32.mrb[10].mxu0 }
 0x16c   : > { %646 = vst [vmem:[#allocation2 + $0x9] sm:$0xff] %v614_v15  ;;  %v615_v19 = vadd.f32 %v583_v0, %v401_v5  ;;  %553 = vst [vmem:[#allocation2 + $0x28] sm:$0xff] %v413_v18  ;;  %v415_v20 = vpop.f32.mrb[11].mxu0 }
 0x16d   : > { %v1017_v21 = vld [vmem:[#allocation2] sm:$0xff] }
 0x16e   : > { %v1049_v23 = vmul.f32 %v1017_v21, %v852_v17  ;;  %647 = vst [vmem:[#allocation2 + $0x11] sm:$0xff] %v615_v19 }
 0x170   : > { %1081 = vst [vmem:[%s1544_s21] sm:$0xff] %v1049_v23 }
 0x171   : > { %v584_v25 = vld [vmem:[#allocation2 + $0x19] sm:$0xff]  ;;  %v419_v26 = vpop.f32.mrb[12].mxu0 }
 0x172   : > { %v616_v27 = vadd.f32 %v584_v25, %v405_v10  ;;  %554 = vst [vmem:[#allocation2 + $0x30] sm:$0xff] %v419_v26  ;;  %v421_v28 = vpop.f32.mrb[13].mxu0 }
 0x173   : > { %v1018_v29 = vld [vmem:[#allocation2 + $0x8] sm:$0xff]  ;;  %v423_v31 = vpop.f32.mrb[14].mxu0 }
 0x174   : > { %v585_v30 = vld [vmem:[#allocation2 + $0x21] sm:$0xff]  ;;  %v1050_v32 = vmul.f32 %v1018_v29, %v986_v24  ;;  %648 = vst [vmem:[#allocation2 + $0x19] sm:$0xff] %v616_v27  ;;  %555 = vst [vmem:[#allocation2 + $0x38] sm:$0xff] %v423_v31  ;;  %v425_v34 = vpop.f32.mrb[15].mxu0 }
 0x175   : > { %v617_v33 = vadd.f32 %v585_v30, %v411_v16  ;;  %v1019_v35 = vld [vmem:[#allocation2 + $0x10] sm:$0xff] }
 0x176   : > { %1082 = vst [vmem:[%s1544_s21 + $0x8] sm:$0xff] %v1050_v32  ;;  %v1051_v36 = vmul.f32 %v1541_v44, %v1019_v35 }
 0x177   : > { %649 = vst [vmem:[#allocation2 + $0x21] sm:$0xff] %v617_v33 }
 0x178   : > { %1083 = vst [vmem:[%s1544_s21 + $0x10] sm:$0xff] %v1051_v36 }
 0x179   : > { %v586_v37 = vld [vmem:[#allocation2 + $0x29] sm:$0xff]  ;;  %v429_v38 = vpop.f32.mrb[16].mxu0 }
 0x17a   : > { %v618_v39 = vadd.f32 %v586_v37, %v415_v20  ;;  %556 = vst [vmem:[#allocation2 + $0x40] sm:$0xff] %v429_v38  ;;  %v431_v40 = vpop.f32.mrb[17].mxu0 }
 0x17b   : > { %v1020_v41 = vld [vmem:[#allocation2 + $0x18] sm:$0xff]  ;;  %v433_v43 = vpop.f32.mrb[18].mxu0 }
 0x17c   : > { %v587_v42 = vld [vmem:[#allocation2 + $0x31] sm:$0xff]  ;;  %v1052_v45 = vmul.f32 %v1541_v44, %v1020_v41  ;;  %650 = vst [vmem:[#allocation2 + $0x29] sm:$0xff] %v618_v39  ;;  %557 = vst [vmem:[#allocation2 + $0x48] sm:$0xff] %v433_v43  ;;  %v435_v47 = vpop.f32.mrb[19].mxu0 }
 0x17d   : > { %v619_v46 = vadd.f32 %v587_v42, %v421_v28 }
 0x17e   : > { %v1021_v48 = vld [vmem:[#allocation2 + $0x20] sm:$0xff]  ;;  %1084 = vst [vmem:[%s1544_s21 + $0x18] sm:$0xff] %v1052_v45 }
 0x17f   : > { %v1053_v49 = vmul.f32 %v1541_v44, %v1021_v48  ;;  %651 = vst [vmem:[#allocation2 + $0x31] sm:$0xff] %v619_v46 }
 0x181   : > { %1085 = vst [vmem:[%s1544_s21 + $0x20] sm:$0xff] %v1053_v49  ;;  %v588_v50 = vld [vmem:[#allocation2 + $0x39] sm:$0xff]  ;;  %v439_v51 = vpop.f32.mrb[20].mxu0 }
 0x182   : > { %v620_v52 = vadd.f32 %v588_v50, %v425_v34  ;;  %558 = vst [vmem:[#allocation2 + $0x50] sm:$0xff] %v439_v51  ;;  %v441_v53 = vpop.f32.mrb[21].mxu0 }
 0x183   : > { %v1022_v54 = vld [vmem:[#allocation2 + $0x28] sm:$0xff]  ;;  %v443_v56 = vpop.f32.mrb[22].mxu0 }
 0x184   : > { %v589_v55 = vld [vmem:[#allocation2 + $0x41] sm:$0xff]  ;;  %v1054_v57 = vmul.f32 %v1541_v44, %v1022_v54  ;;  %652 = vst [vmem:[#allocation2 + $0x39] sm:$0xff] %v620_v52  ;;  %559 = vst [vmem:[#allocation2 + $0x58] sm:$0xff] %v443_v56  ;;  %v445_v59 = vpop.f32.mrb[23].mxu0 }
 0x185   : > { %v621_v58 = vadd.f32 %v589_v55, %v431_v40 }
 0x186   : > { %v1023_v60 = vld [vmem:[#allocation2 + $0x30] sm:$0xff]  ;;  %1086 = vst [vmem:[%s1544_s21 + $0x28] sm:$0xff] %v1054_v57 }
 0x187   : > { %v1055_v61 = vmul.f32 %v1541_v44, %v1023_v60  ;;  %653 = vst [vmem:[#allocation2 + $0x41] sm:$0xff] %v621_v58 }
 0x189   : > { %1087 = vst [vmem:[%s1544_s21 + $0x30] sm:$0xff] %v1055_v61  ;;  %v590_v62 = vld [vmem:[#allocation2 + $0x49] sm:$0xff]  ;;  %v449_v63 = vpop.f32.mrb[24].mxu0 }
 0x18a   : > { %v622_v1 = vadd.f32 %v590_v62, %v435_v47  ;;  %560 = vst [vmem:[#allocation2 + $0x60] sm:$0xff] %v449_v63  ;;  %v451_v2 = vpop.f32.mrb[25].mxu0 }
 0x18b   : > { %v1024_v3 = vld [vmem:[#allocation2 + $0x38] sm:$0xff]  ;;  %v453_v5 = vpop.f32.mrb[26].mxu0 }
 0x18c   : > { %v591_v4 = vld [vmem:[#allocation2 + $0x51] sm:$0xff]  ;;  %v1056_v6 = vmul.f32 %v1541_v44, %v1024_v3  ;;  %654 = vst [vmem:[#allocation2 + $0x49] sm:$0xff] %v622_v1  ;;  %561 = vst [vmem:[#allocation2 + $0x68] sm:$0xff] %v453_v5  ;;  %v455_v8 = vpop.f32.mrb[27].mxu0 }
 0x18d   : > { %v623_v7 = vadd.f32 %v591_v4, %v441_v53 }
 0x18e   : > { %v1025_v9 = vld [vmem:[#allocation2 + $0x40] sm:$0xff]  ;;  %1088 = vst [vmem:[%s1544_s21 + $0x38] sm:$0xff] %v1056_v6 }
 0x18f   : > { %v1057_v10 = vmul.f32 %v1541_v44, %v1025_v9  ;;  %655 = vst [vmem:[#allocation2 + $0x51] sm:$0xff] %v623_v7 }
 0x191   : > { %1089 = vst [vmem:[%s1544_s21 + $0x40] sm:$0xff] %v1057_v10  ;;  %v592_v11 = vld [vmem:[#allocation2 + $0x59] sm:$0xff]  ;;  %v459_v12 = vpop.f32.mrb[28].mxu0 }
 0x192   : > { %v624_v13 = vadd.f32 %v592_v11, %v445_v59  ;;  %562 = vst [vmem:[#allocation2 + $0x70] sm:$0xff] %v459_v12  ;;  %v461_v14 = vpop.f32.mrb[29].mxu0 }
 0x193   : > { %v1026_v15 = vld [vmem:[#allocation2 + $0x48] sm:$0xff]  ;;  %v463_v17 = vpop.f32.mrb[30].mxu0 }
 0x194   : > { %v593_v16 = vld [vmem:[#allocation2 + $0x61] sm:$0xff]  ;;  %v1058_v0 = vmul.f32 %v1541_v44, %v1026_v15  ;;  %656 = vst [vmem:[#allocation2 + $0x59] sm:$0xff] %v624_v13  ;;  %563 = vst [vmem:[#allocation2 + $0x78] sm:$0xff] %v463_v17  ;;  %v465_v19 = vpop.f32.mrb[31].mxu0 }
 0x195   : > { %v625_v18 = vadd.f32 %v593_v16, %v451_v2 }
 0x196   : > { %v1027_v20 = vld [vmem:[#allocation2 + $0x50] sm:$0xff]  ;;  %1090 = vst [vmem:[%s1544_s21 + $0x48] sm:$0xff] %v1058_v0 }
 0x197   : > { %v1059_v21 = vmul.f32 %v1541_v44, %v1027_v20  ;;  %657 = vst [vmem:[#allocation2 + $0x61] sm:$0xff] %v625_v18 }
 0x199   : > { %1091 = vst [vmem:[%s1544_s21 + $0x50] sm:$0xff] %v1059_v21  ;;  %v594_v22 = vld [vmem:[#allocation2 + $0x69] sm:$0xff] }
 0x19a   : > { %v626_v23 = vadd.f32 %v594_v22, %v455_v8 }
 0x19b   : > { %v1028_v24 = vld [vmem:[#allocation2 + $0x58] sm:$0xff] }
 0x19c   : > { %v595_v25 = vld [vmem:[#allocation2 + $0x71] sm:$0xff]  ;;  %v596_v26 = vld [vmem:[#allocation2 + $0x79] sm:$0xff]  ;;  %v1060_v27 = vmul.f32 %v1541_v44, %v1028_v24  ;;  %658 = vst [vmem:[#allocation2 + $0x69] sm:$0xff] %v626_v23 }
 0x19d   : > { %v627_v28 = vadd.f32 %v595_v25, %v461_v14  ;;  %v628_v29 = vadd.f32 %v596_v26, %v465_v19 }
 0x19e   : > { %v1029_v30 = vld [vmem:[#allocation2 + $0x60] sm:$0xff]  ;;  %1092 = vst [vmem:[%s1544_s21 + $0x58] sm:$0xff] %v1060_v27 }
 0x19f   : > { %v1061_v31 = vmul.f32 %v1541_v44, %v1029_v30  ;;  %659 = vst [vmem:[#allocation2 + $0x71] sm:$0xff] %v627_v28  ;;  %660 = vst [vmem:[#allocation2 + $0x79] sm:$0xff] %v628_v29 }
 0x1a1   : > { %1093 = vst [vmem:[%s1544_s21 + $0x60] sm:$0xff] %v1061_v31 }
 0x1a3   : > { %v1030_v32 = vld [vmem:[#allocation2 + $0x68] sm:$0xff] }
 0x1a4   : > { %v1062_v33 = vmul.f32 %v1541_v44, %v1030_v32 }
 0x1a6   : > { %v1031_v34 = vld [vmem:[#allocation2 + $0x70] sm:$0xff]  ;;  %v1032_v35 = vld [vmem:[#allocation2 + $0x78] sm:$0xff]  ;;  %v1033_v36 = vld [vmem:[#allocation2 + $0x80] sm:$0xff]  ;;  %1094 = vst [vmem:[%s1544_s21 + $0x68] sm:$0xff] %v1062_v33 }
 0x1a7   : > { %v1063_v37 = vmul.f32 %v1541_v44, %v1031_v34  ;;  %v1064_v38 = vmul.f32 %v1541_v44, %v1032_v35  ;;  %v1065_v39 = vmul.f32 %v1541_v44, %v1033_v36 }
 0x1a9   : > { %1095 = vst [vmem:[%s1544_s21 + $0x70] sm:$0xff] %v1063_v37  ;;  %1096 = vst [vmem:[%s1544_s21 + $0x78] sm:$0xff] %v1064_v38 }
 0x1aa   : > { %1097 = vst [vmem:[%s1544_s21 + $0x80] sm:$0xff] %v1065_v39 }
 0x1ab   : > { %1330 = shalt.err (!%p1327_p5)
}
 0x1ac   : > { %s1331_s10 = scalar_lea.hbm %s1614_s6, 4096  ;;  %s1335_s21 = scalar_lea.hbm %s1676_s3, 8192 }
 0x1ad   : > { %p1332_p6 = scmp.ne.s32.totalorder %s1614_s6, %s1331_s10  ;;  %p1336_p10 = scmp.lt.u32.totalorder %s1614_s6, %s1676_s3 }
 0x1ae   : > { %p1337_p11 = scmp.lt.u32.totalorder %s1335_s21, %s1331_s10  ;;  %p1339_p13 = scmp.lt.u32.totalorder %s1331_s10, %s1614_s6 }
 0x1af   : > { %p1333_p7 = pnand %p1332_p6, %p1462_p4 }
 0x1b0   : > { %p1338_p12 = por %p1337_p11, %p1336_p10 }
 0x1b1   : > { %p1334_p9 = pneg %p1333_p7 }
 0x1b2   : > { %p1340_p0 = por %p1339_p13, %p1338_p12 }
 0x1b4   : > { %p1341_p1 = pnand %p1340_p0, %p1334_p9 }
 0x1b6   : > { %1344 = shalt.err (!%p1341_p1)
}
 0x1b7   : > { %s1400_s27 = smov 128   ;;  %s1401_s28 = smov 8  }
 0x1b8   : > { %1252 = dma.vmem_to_hbm [thread:$0]  (%p1462_p4), %s1616_s30, 4096, %s1614_s6, %s1627_s15, %s1400_s27, %s1400_s27, %s1401_s28  }
 0x1b9 PF: > { %p1258_p2 = scmp.ge.s32.totalorder %s1395_s17, 2  ;;  %s1146_s29 = sand.u32 1, %s1375_s12  }
 0x1ba   : > { %s1147_s4 = scalar_lea.sflag [#allocation5], %s1146_s29 }
 0x1bb   : > { %p1255_p3 = pnand %p1258_p2, %p1469_p8 }
 0x1bd   : > { %1370 = dma.done.wait (!%p1255_p3), %s1147_s4, 4096  }
 0x1be   : > { %1372 = vsyncadd (!%p1255_p3), %s1147_s4, 4294963200  ;;  %s16_s17 = sadd.s32 1, %s1395_s17   ;;  %s1679_s12 = smov %s1379_s13 }
 0x1bf   : > { %p13_p5 = scmp.ge.s32.totalorder %s16_s17, 4   ;;  %s1680_s13 = smov %s1383_s14 }
 0x1c0   : > { %s1681_s14 = smov %s1475_s25  ;;  %s1682_s15 = smov %s1391_s16 }
 0x1c1   : > { %s1683_s16 = smov %s1685_s20  ;;  %15 = sbr.rel (!%p13_p5) target bundleno = 4 (0x4), region = 71 }
 0x1c8   :  { %1152 = vsyncpa [#allocation5], 1 }
 0x1c9   :  { %1154 = vsyncpa [#allocation5 + $0x1], 1 }

</bundles_post_ra>
